<compile_context>
chip_gen: v7x
topology: tpu7x:2x2x1
jax: 0.10.0
libtpu: 0.0.40
codegen_flags: <defaults>
</compile_context>

<pallas_src>
import functools

import jax
import jax.numpy as jnp
from jax.experimental import pallas as pl
from jax.experimental.pallas import tpu as pltpu

_MiB = 1024 * 1024


def _budget_and_phys_vmem(block_budget_bytes=None):
    """Pick a per-input-block byte budget + physical VMEM, generation-aware."""
    phys_vmem = None
    try:
        phys_vmem = int(pltpu.get_tpu_info().vmem_capacity_bytes)
    except Exception:
        phys_vmem = None
    if phys_vmem is None or phys_vmem <= 0:
        phys_vmem = 64 * _MiB  # conservative: assume v7x-sized VMEM per core
    if block_budget_bytes is not None:
        return int(block_budget_bytes), phys_vmem
    if phys_vmem <= 64 * _MiB:
        budget = 12 * _MiB   # v7x: 3.2 TB/s HBM -> bigger blocks amortize step overhead
    else:
        budget = 8 * _MiB    # v5e/v6e: 128 MiB VMEM, lower HBM BW
    return budget, phys_vmem


def _pick_tiles(c, s, itemsize, budget):
    """Choose (channel_tile, spatial_tile) for an input block of <= budget bytes."""
    min_sublane = max(8, 32 // itemsize)  # f32: 8, bf16: 16, int8/fp8: 32

    # Case 1: the whole (C, S) slab of one batch element fits -> direct kernel.
    if c * s * itemsize <= budget:
        return c, s

    # Case 2: keep full, contiguous spatial rows; tile only channels.
    row_bytes = s * itemsize
    if min_sublane * row_bytes <= budget:
        tc = (budget // row_bytes) // min_sublane * min_sublane
        return min(tc, c), s

    # Case 3: even min_sublane full rows overflow; tile the spatial axis too.
    tc = min(min_sublane, c)
    max_lanes = max(128, (budget // (tc * itemsize)) // 128 * 128)
    return tc, min(s, max_lanes)


def _mask_padded_channels(x, c_idx, tc, c_total):
    """Zero out channel rows that lie past C (ragged last channel block)."""
    if c_total % tc == 0:  # static: no padded rows anywhere
        return x
    ch = c_idx * tc + jax.lax.broadcasted_iota(jnp.int32, x.shape, dimension=1)
    return jnp.where(ch < c_total, x, 0.0)


def _sum_channels_direct_kernel(x_ref, o_ref, *, inv_c, c_total, tc):
    """Full channel extent fits in one block: no scratch, no init/finalize."""
    x = x_ref[...]
    if x.dtype != jnp.float32:
        x = x.astype(jnp.float32)
    x = _mask_padded_channels(x, 0, tc, c_total)
    o_ref[...] = (jnp.sum(x, axis=1, keepdims=True) * inv_c).astype(o_ref.dtype)


def _sum_channels_acc_kernel(x_ref, o_ref, acc_ref, *, inv_c, c_total, tc):
    """Channel-tiled reduction carried in an (1, 8, ts) f32 VMEM accumulator."""
    c_idx = pl.program_id(2)

    @pl.when(c_idx == 0)
    def _init():
        acc_ref[...] = jnp.zeros_like(acc_ref)

    x = x_ref[...]
    if x.dtype != jnp.float32:
        x = x.astype(jnp.float32)
    x = _mask_padded_channels(x, c_idx, tc, c_total)

    ts = x.shape[-1]
    # Reduce each (tc, ts) tile only down to 8 sublanes: pure VPU vreg adds
    # per step (no per-step XLU cross-sublane reduce). tc is a multiple of 8.
    acc_ref[...] += jnp.sum(x.reshape(1, tc // 8, 8, ts), axis=1)

    @pl.when(c_idx == pl.num_programs(2) - 1)
    def _finalize():
        o_ref[...] = (
            jnp.sum(acc_ref[...], axis=1, keepdims=True) * inv_c
        ).astype(o_ref.dtype)


def sum_channels(x: jax.Array, nb_channels: int, *, block_budget_bytes=None) -> jax.Array:
    """Pallas implementation of SumChannels.forward (NCHW)."""
    n, c, h, w = x.shape
    assert c == nb_channels, "nb_channels must match the channel dim of x"
    inv_c = 1.0 / float(nb_channels)

    s_total = h * w
    itemsize = x.dtype.itemsize
    x_flat = x.reshape(n, c, s_total)  # lane-dense layout (free reshape)

    budget, phys_vmem = _budget_and_phys_vmem(block_budget_bytes)
    tc, ts = _pick_tiles(c, s_total, itemsize, budget)

    # v7x has 2 TensorCores per chip: keep >=2 blocks on the parallel
    # (batch x spatial) axes so the grid can be sharded across them. Costs one
    # extra tiny grid step on single-core chips, which is negligible.
    if n == 1 and ts == s_total and s_total >= 256:
        ts_half = (((s_total + 1) // 2) + 127) // 128 * 128
        if ts_half < s_total:
            ts = ts_half

    num_s = pl.cdiv(s_total, ts)
    num_c = pl.cdiv(c, tc)

    if num_c == 1:
        kernel = functools.partial(
            _sum_channels_direct_kernel, inv_c=inv_c, c_total=c, tc=tc)
        scratch_shapes = []
        acc_bytes = 0
    else:
        kernel = functools.partial(
            _sum_channels_acc_kernel, inv_c=inv_c, c_total=c, tc=tc)
        scratch_shapes = [pltpu.VMEM((1, 8, ts), jnp.float32)]
        acc_bytes = 8 * ts * 4

    # VMEM limit sized to the actual blocks (double-buffered in/out + acc),
    # capped so it always fits v7x's 64 MiB/TC physical VMEM.
    in_block = tc * ts * itemsize
    out_block = ts * itemsize
    needed = 2 * in_block + 2 * out_block + acc_bytes
    vmem_limit = min(
        max(needed + 8 * _MiB, 32 * _MiB),
        max(phys_vmem - 16 * _MiB, 32 * _MiB),
    )

    cost = pl.CostEstimate(
        flops=n * c * s_total,
        transcendentals=0,
        bytes_accessed=n * c * s_total * itemsize + n * s_total * itemsize,
    )

    out_flat = pl.pallas_call(
        kernel,
        out_shape=jax.ShapeDtypeStruct((n, 1, s_total), x.dtype),
        grid=(n, num_s, num_c),
        in_specs=[pl.BlockSpec((1, tc, ts), lambda b, si, ci: (b, ci, si))],
        out_specs=pl.BlockSpec((1, 1, ts), lambda b, si, ci: (b, 0, si)),
        scratch_shapes=scratch_shapes,
        compiler_params=pltpu.CompilerParams(
            dimension_semantics=("parallel", "parallel", "arbitrary"),
            vmem_limit_bytes=int(vmem_limit),
        ),
        cost_estimate=cost,
    )(x_flat)

    return out_flat.reshape(n, 1, h, w)


if __name__ == "__main__":
    key = jax.random.PRNGKey(0)

    # 1) Module-consistent small shape, default generation-aware tiling:
    #    whole (C, S) slab fits one block -> direct single-step kernel.
    N, C, H, W = 2, 4, 16, 16
    x = jax.random.normal(key, (N, C, H, W), dtype=jnp.float32)
    y = jax.block_until_ready(sum_channels(x, nb_channels=C))
    y_ref = jnp.sum(x, axis=1, keepdims=True) / C
    assert y.shape == (N, 1, H, W)
    assert jnp.allclose(y, y_ref, atol=1e-6, rtol=1e-6)

    # 2) Exercise the channel-tiled accumulator path (ragged C, masking) by
    #    forcing a tiny block budget at small shapes.
    C2 = 20
    x2 = jax.random.normal(jax.random.PRNGKey(1), (N, C2, H, W), dtype=jnp.float32)
    y2_ref = jnp.sum(x2, axis=1, keepdims=True) / C2
    y2 = jax.block_until_ready(
        sum_channels(x2, nb_channels=C2, block_budget_bytes=8 * H * W * 4))
    assert jnp.allclose(y2, y2_ref, atol=1e-5, rtol=1e-5)

    # 3) Exercise channel + spatial tiling.
    y3 = jax.block_until_ready(
        sum_channels(x2, nb_channels=C2, block_budget_bytes=8 * 128 * 4))
    assert jnp.allclose(y3, y2_ref, atol=1e-5, rtol=1e-5)

    # 4) bf16 input on the channel-tiled path (16-sublane channel blocks).
    x4 = x2.astype(jnp.bfloat16)
    y4 = jax.block_until_ready(
        sum_channels(x4, nb_channels=C2, block_budget_bytes=16 * H * W * 2))
    y4_ref = (jnp.sum(x4.astype(jnp.float32), axis=1, keepdims=True) / C2
              ).astype(jnp.bfloat16)
    assert jnp.allclose(y4.astype(jnp.float32), y4_ref.astype(jnp.float32),
                        atol=2e-2, rtol=2e-2)

    print("KERNEL_OK")
</pallas_src>

<mosaic_0001>
module attributes {stable_mosaic.version = 11 : i64} {
  func.func @_sum_channels_direct_kernel(%arg0: i32, %arg1: i32, %arg2: i32, %arg3: memref<1x4x256xf32, #tpu.memory_space<vmem>>, %arg4: memref<1x1x256xf32, #tpu.memory_space<vmem>>) attributes {dimension_semantics = [#tpu.dimension_semantics<parallel>, #tpu.dimension_semantics<parallel>, #tpu.dimension_semantics<arbitrary>], iteration_bounds = array<i64: 2, 1, 1>, scalar_prefetch = 0 : i64, scratch_operands = 0 : i64, tpu.core_type = #tpu.core_type<tc>, window_params = [{transform_indices = @transform_0, window_bounds = array<i64: 1, 4, 256>}, {transform_indices = @transform_1, window_bounds = array<i64: 1, 1, 256>}]} {
    %c0 = arith.constant 0 : index
    %c0_0 = arith.constant 0 : index
    %c0_1 = arith.constant 0 : index
    %0 = vector.load %arg3[%c0, %c0_0, %c0_1] : memref<1x4x256xf32, #tpu.memory_space<vmem>>, vector<1x4x256xf32>
    %cst = arith.constant dense<0.000000e+00> : vector<1x256xf32>
    %1 = vector.multi_reduction <add>, %0, %cst [1] : vector<1x4x256xf32> to vector<1x256xf32>
    %2 = vector.shape_cast %1 : vector<1x256xf32> to vector<1x1x256xf32>
    %cst_2 = arith.constant 2.500000e-01 : f32
    %3 = vector.broadcast %cst_2 : f32 to vector<1x1x256xf32>
    %4 = arith.mulf %2, %3 : vector<1x1x256xf32>
    %c0_3 = arith.constant 0 : index
    %c0_4 = arith.constant 0 : index
    %c0_5 = arith.constant 0 : index
    %5 = vector.load %arg4[%c0_3, %c0_4, %c0_5] : memref<1x1x256xf32, #tpu.memory_space<vmem>>, vector<1x1x256xf32>
    tpu.vector_store %arg4[%c0_3, %c0_4, %c0_5], %4 {strides = array<i32>} : memref<1x1x256xf32, #tpu.memory_space<vmem>>, vector<1x1x256xf32>,
    return
  }
  func.func @transform_0(%arg0: i32, %arg1: i32, %arg2: i32) -> (i32, i32, i32) {
    %c0_i32 = arith.constant 0 : i32
    return %arg0, %arg2, %arg1 : i32, i32, i32
  }
  func.func @transform_1(%arg0: i32, %arg1: i32, %arg2: i32) -> (i32, i32, i32) {
    %c0_i32 = arith.constant 0 : i32
    %c0_i32_0 = arith.constant 0 : i32
    return %arg0, %c0_i32, %arg1 : i32, i32, i32
  }
}

</mosaic_0001>

<bundles_post_ra>
// kernel: tpu_custom_call.1
= control target key start
LH: loop header
LB: loop body
LE: loop exit
PB: predicated region body
PF: predicated region fallthrough
CT: control target
= control target key end

     0   :  { %6 = vsyncpa [#allocation3], 0  ;;  %s692_s0 = inlined_call_operand.hbm [shape: f32[2,4,256], index: 0, kind: input, shape index: {}]   ;;  %s693_s1 = inlined_call_operand.hbm [shape: f32[2,1,256], index: 1, kind: output, shape index: {}]  }
   0x1   :  { %8 = vsyncpa [#allocation3 + $0x1], 0 }
   0x2   :  { %9 = vsyncpa [#allocation4], 0 }
   0x3   :  { %11 = vsyncpa [#allocation4 + $0x1], 0  ;;  %s519_s6 = smov 0   ;;  %s521_s7 = smov 0  }
   0x4   :  { %s523_s8 = smov 0   ;;  %s525_s9 = smov 0  }
   0x5   :  { %s527_s10 = smov 0   ;;  %s529_s11 = smov 0  }
   0x6 LB: > { %s311_s12 = sadd.s32 4294967295, %s504_s11   ;;  %s312_s13 = sadd.s32 4294967294, %s504_s11   ;;  %s504_s11 = sphi %s529_s11, %s17_s11   ;;  %s500_s10 = sphi %s527_s10, %s709_s10   ;;  %s496_s9 = sphi %s525_s9, %s708_s9   ;;  %s492_s8 = sphi %s523_s8, %s707_s8   ;;  %s488_s7 = sphi %s521_s7, %s706_s7   ;;  %s484_s6 = sphi %s519_s6, %s705_s6  }
   0x7   : > { %s36_s14 = sadd.s32 1, %s500_s10  ;;  %s47_s15 = sadd.s32 1, %s492_s8 }
   0x8   : > { %p38_p0 = scmp.ge.s32.totalorder %s36_s14, 2  ;;  %p54_p1 = scmp.ne.s32.totalorder %s492_s8, %s488_s7 }
   0x9   : > { %p55_p2 = scmp.eq.s32.totalorder %s504_s11, 0  ;;  %p60_p3 = scmp.ne.s32.totalorder %s488_s7, %s484_s6 }
   0xa   : > { %s711_s14 = smov (%p38_p0, %s36_s14), 0  ;;  %p61_p5 = scmp.eq.s32.totalorder %s311_s12, 0 }
   0xb   : > { %p560_p4 = por %p55_p2, %p54_p1  ;;  %s40_s17 = ssub.s32 %s500_s10, %s711_s14 }
   0xc   : > { %p86_p6 = scmp.eq.s32.totalorder %s311_s12, 1  ;;  %p45_p7 = scmp.eq.s32.totalorder %s40_s17, 0 }
   0xd   : > { %p566_p8 = por %p61_p5, %p60_p3  ;;  %p92_p10 = scmp.eq.s32.totalorder %s312_s13, 1 }
   0xe   : > { %p570_p9 = por %p86_p6, %p54_p1  ;;  %p340_p13 = scmp.lt.s32.totalorder %s504_s11, 2 }
   0xf   : > { %s575_s20 = scalar_select %p45_p7, %s492_s8, %s47_s15  }
  0x10   : > { %s697_s19 = scalar_select %p570_p9, 1, 0 }
  0x11   : > { %p577_p11 = por %p92_p10, %p60_p3  ;;  %s112_s22 = sand.u32 1, %s492_s8  }
  0x12   : > { %s315_s23 = sshll.u32 %s112_s22, 3  ;;  %s326_s24 = sshll.u32 %s500_s10, 7 }
  0x13   : > { %s698_s21 = scalar_select %p577_p11, 1, 0 }
  0x14   : > { %s588_s27 = scalar_lea.hbm %s692_s0, %s326_s24  ;;  %s116_s28 = scalar_lea.vmem [#allocation2], %s315_s23 }
  0x15   : > { %s128_s29 = sshll.u32 %s116_s28, 4  ;;  %p594_p0 = pnand %p340_p13, %p560_p4  ;;  %s590_s29 = int_to_ptr.vmem [resolvable:$true] %s128_s29 }
  0x16   : > { %s113_s2 = scalar_lea.sflag [#allocation3], %s112_s22  ;;  %s392_s3 = scalar_lea.hbm %s588_s27, 128 }
  0x17   : > { %p393_p3 = scmp.ne.s32.totalorder %s588_s27, %s392_s3  ;;  %p394_p5 = pneg %p594_p0 }
  0x18   : > { %s397_s12 = scalar_lea.hbm %s692_s0, 256  ;;  %p398_p4 = scmp.lt.u32.totalorder %s588_s27, %s692_s0 }
  0x19   : > { %p395_p6 = pnand %p394_p5, %p393_p3  ;;  %p399_p10 = scmp.lt.u32.totalorder %s397_s12, %s392_s3 }
  0x1a   : > { %p401_p12 = scmp.lt.u32.totalorder %s392_s3, %s588_s27 }
  0x1b   : > { %p396_p7 = pneg %p395_p6  ;;  %p400_p13 = por %p399_p10, %p398_p4 }
  0x1d   : > { %p402_p1 = por %p401_p12, %p400_p13 }
  0x1f   : > { %p403_p2 = pnand %p402_p1, %p396_p7 }
  0x21   : > { %406 = shalt.err (!%p403_p2)
}
  0x22   : > { %s407_s16 = scalar_lea.vmem %s590_s29, 128  ;;  %s506_s17 = smov [#allocation2]  }
  0x23   : > { %p408_p3 = scmp.ne.s32.totalorder %s590_s29, %s407_s16  ;;  %s412_s22 = sshll.u32 %s506_s17, 4  ;;  %s413_s22 = int_to_ptr.vmem [resolvable:$false] %s412_s22 }
  0x24   : > { %s414_s23 = scalar_lea.vmem %s413_s22, 256  ;;  %p415_p9 = scmp.lt.s32.totalorder %s590_s29, %s413_s22 }
  0x25   : > { %p410_p6 = pnand %p408_p3, %p394_p5  ;;  %p416_p4 = scmp.lt.s32.totalorder %s414_s23, %s407_s16 }
  0x27   : > { %p411_p11 = pneg %p410_p6  ;;  %p417_p10 = por %p416_p4, %p415_p9 }
  0x29   : > { %p418_p12 = pnand %p417_p10, %p411_p11 }
  0x2b   : > { %421 = shalt.err (!%p418_p12)
}
  0x2c   : > { %335 = dma.hbm_to_vmem [thread:$0]  (!%p594_p0), %s588_s27, 128, %s590_s29, %s113_s2  }
  0x2d   : > { %p700_p1 = scmp.lt.s32.totalorder %s504_s11, 3  ;;  %p701_p2 = scmp.ge.s32.totalorder %s504_s11, 1 }
  0x2f   : > { %p134_p5 = pnand %p701_p2, %p700_p1 }
  0x30   : > { %s630_s24 = sand.u32 (!%p134_p5), 1, %s488_s7  }
  0x31   : > { %137 = sbr.rel (%p134_p5) target bundleno = 95 (0x5f), region = 24  ;;  %s319_s25 = sshll.u32 (!%p134_p5), %s630_s24, 3 }
  0x32   : > { %s140_s26 = scalar_lea.sflag (!%p134_p5), [#allocation3], %s630_s24  ;;  %s143_s28 = scalar_lea.vmem (!%p134_p5), [#allocation2], %s319_s25 }
  0x38   : > { %475 = dma.done.wait (%p566_p8), %s140_s26, 128  }
  0x39   : > { %477 = vsyncadd (%p566_p8), %s140_s26, 4294967168  ;;  %vm168_vm0 = vcmask 1043456   ;;  %v164_v0 = vld [vmem:[%s143_s28] sm:$0xff]  ;;  %v507_v11 = vmov 1966171168   ;;  %v191_v13 = vlaneseq  ;;  %s320_s18 = sshll.u32 %s630_s24, 1 }
  0x3a   : > { %v166_v1 = vcombine.high %v164_v0, %v164_v0  ;;  %v169_v2 = vsel %vm168_vm0, %v164_v0, 0.0  ;;  %v189_v12 = vunpack.c.l.s4 %v507_v11  ;;  %s161_s27 = scalar_lea.vmem [#allocation5], %s320_s18  ;;  %s327_s30 = sshll.u32 %s496_s9, 5 }
  0x3b   : > { %v170_v3 = vrot.slane %v169_v2, 4  ;;  %v192_v19 = vshrl.u32 %v191_v13, 7  ;;  %s225_s29 = sshll.u32 %s161_s27, 4  ;;  %vm205_vm1 = vcmp.lt.s32.totalorder %v191_v13, 256  ;;  %s645_s4 = scalar_lea.hbm %s693_s1, %s327_s30  ;;  %s640_s29 = int_to_ptr.vmem [resolvable:$true] %s225_s29 }
  0x3c   : > { %v176_v4 = vsel %vm168_vm0, %v166_v1, 0.0  ;;  %v190_v18 = vunpack.c.0.s8 %v189_v12  ;;  %s209_s5 = scalar_lea.sflag [#allocation4], %s630_s24  ;;  %s422_s12 = scalar_lea.vmem %s640_s29, 32 }
  0x3d   : > { %v171_v5 = vadd.f32 %v170_v3, %v169_v2  ;;  %v177_v6 = vrot.slane %v176_v4, 4  ;;  %p423_p8 = scmp.ne.s32.totalorder %s640_s29, %s422_s12  ;;  %p702_p9 = scmp.ne.s32.totalorder %s697_s19, 0 }
  0x3e   : > { %v193_v23 = vsub.s32 %v190_v18, %v192_v19  ;;  %s508_s9 = smov [#allocation5]  }
  0x3f   : > { %v172_v7 = vrot.slane %v171_v5, 2  ;;  %v178_v8 = vadd.f32 %v177_v6, %v176_v4  ;;  %p424_p11 = pnand %p423_p8, %p702_p9  ;;  %s426_s13 = sshll.u32 %s508_s9, 4  ;;  %s427_s13 = int_to_ptr.vmem [resolvable:$false] %s426_s13 }
  0x40   : > { %s428_s15 = scalar_lea.vmem %s427_s13, 64  ;;  %p429_p7 = scmp.lt.s32.totalorder %s640_s29, %s427_s13 }
  0x41   : > { %v173_v9 = vadd.f32 %v172_v7, %v171_v5  ;;  %v179_v10 = vrot.slane %v178_v8, 2  ;;  %p425_p0 = pneg %p424_p11  ;;  %p430_p13 = scmp.lt.s32.totalorder %s428_s15, %s422_s12 }
  0x43   : > { %v174_v14 = vrot.slane %v173_v9, 1  ;;  %v180_v15 = vadd.f32 %v179_v10, %v178_v8  ;;  %p431_p3 = por %p430_p13, %p429_p7 }
  0x45   : > { %v175_v16 = vadd.f32 %v174_v14, %v173_v9  ;;  %v181_v17 = vrot.slane %v180_v15, 1  ;;  %p432_p6 = pnand %p431_p3, %p425_p0 }
  0x47   : > { %v182_v20 = vadd.f32 %v181_v17, %v180_v15  ;;  %v183_v21 = vmul.f32 0.25, %v175_v16 }
  0x49   : > { %v184_v22 = vmul.f32 0.25, %v182_v20 }
  0x4b   : > { %v187_v24 = vcombine.low %v183_v21, %v184_v22 }
  0x4d   : > { %v194_v25 = vrot.slane %v187_v24, %v193_v23 }
  0x4f   : > { %v201_v26 = vrot.slane %v194_v25, %v193_v23 }
  0x51   : > { %207 = vst.msk [vmem:[%s161_s27] sm:$0x3] %vm205_vm1, %v201_v26 }
  0x52   : > { %435 = shalt.err (!%p432_p6)
}
  0x53   : > { %s436_s16 = scalar_lea.hbm %s645_s4, 32  ;;  %s440_s23 = scalar_lea.hbm %s693_s1, 64 }
  0x54   : > { %p437_p4 = scmp.ne.s32.totalorder %s645_s4, %s436_s16  ;;  %p441_p1 = scmp.lt.u32.totalorder %s645_s4, %s693_s1 }
  0x55   : > { %p442_p2 = scmp.lt.u32.totalorder %s440_s23, %s436_s16  ;;  %p444_p8 = scmp.lt.u32.totalorder %s436_s16, %s645_s4 }
  0x56   : > { %p438_p10 = pnand %p437_p4, %p702_p9 }
  0x57   : > { %p443_p5 = por %p442_p2, %p441_p1 }
  0x58   : > { %p439_p12 = pneg %p438_p10 }
  0x59   : > { %p445_p11 = por %p444_p8, %p443_p5 }
  0x5b   : > { %p446_p0 = pnand %p445_p11, %p439_p12 }
  0x5d   : > { %449 = shalt.err (!%p446_p0)
}
  0x5e   : > { %330 = dma.vmem_to_hbm [thread:$0]  (%p702_p9), %s640_s29, 32, %s645_s4, %s209_s5  }
  0x5f PF: > { %s237_s26 = sand.u32 1, %s484_s6   ;;  %p703_p7 = scmp.ne.s32.totalorder %s698_s21, 0 }
  0x60   : > { %p704_p13 = scmp.ge.s32.totalorder %s504_s11, 2  ;;  %s238_s28 = scalar_lea.sflag [#allocation4], %s237_s26 }
  0x62   : > { %p337_p3 = pnand %p704_p13, %p703_p7 }
  0x64   : > { %479 = dma.done.wait (!%p337_p3), %s238_s28, 32  }
  0x65   : > { %481 = vsyncadd (!%p337_p3), %s238_s28, 4294967264  ;;  %s17_s11 = sadd.s32 1, %s504_s11   ;;  %s705_s6 = smov %s488_s7 }
  0x66   : > { %p14_p6 = scmp.ge.s32.totalorder %s17_s11, 4   ;;  %s706_s7 = smov %s492_s8 }
  0x67   : > { %s707_s8 = smov %s575_s20  ;;  %s708_s9 = smov %s500_s10 }
  0x68   : > { %s709_s10 = smov %s711_s14  ;;  %16 = sbr.rel (!%p14_p6) target bundleno = 6 (0x6), region = 69 }
  0x6f   :  { %243 = vsyncpa [#allocation3], 1 }
  0x70   :  { %245 = vsyncpa [#allocation3 + $0x1], 1 }
  0x71   :  { %246 = vsyncpa [#allocation4], 1 }
  0x72   :  { %248 = vsyncpa [#allocation4 + $0x1], 1 }

</bundles_post_ra>
